<compile_context>
chip_gen: v5e
topology: v5e:2x2
jax: 0.10.0
libtpu: 0.0.40
codegen_flags: <defaults>
</compile_context>

<pallas_src>
import functools

import jax
import jax.numpy as jnp
from jax import lax
from jax.experimental import pallas as pl
from jax.experimental.pallas import tpu as pltpu


# --------------------------------------------------------------------------
# Pallas kernels
# --------------------------------------------------------------------------
def _conv_bn_prelu_kernel(x_ref, w_ref, scale_ref, shift_ref, alpha_ref, o_ref):
    """One (image, spatial-tile) step of the fused branch stage.

    x_ref    : (1, K, T)   im2col columns (rows = tap-major x cin, all branches)
    w_ref    : (Co, K)     block-diagonal weight matrix (resident)
    scale_ref: (Co, 1)     folded BN1 scale
    shift_ref: (Co, 1)     folded BN1 shift
    alpha_ref: (1, 1)      PReLU slope (SMEM)
    o_ref    : (1, Co, T)  BN1(conv)+PReLU output, spatial on lanes
    """
    y = jnp.dot(w_ref[...], x_ref[0], preferred_element_type=jnp.float32)
    z = y * scale_ref[...] + shift_ref[...]
    a = alpha_ref[0, 0]
    o_ref[0] = jnp.where(z >= 0.0, z, a * z).astype(o_ref.dtype)


def _conv_bn_res_prelu_kernel(x_ref, r_ref, w_ref, scale_ref, shift_ref,
                              alpha_ref, o_ref):
    """One (image, spatial-tile) step of the fused branch1x1 stage.

    x_ref : (1, K, T)  im2col of the branch-stage output
    r_ref : (1, Co, T) residual (original input), spatial on lanes
    """
    y = jnp.dot(w_ref[...], x_ref[0], preferred_element_type=jnp.float32)
    z = y * scale_ref[...] + shift_ref[...] + r_ref[0].astype(jnp.float32)
    a = alpha_ref[0, 0]
    o_ref[0] = jnp.where(z >= 0.0, z, a * z).astype(o_ref.dtype)


# --------------------------------------------------------------------------
# pallas_call wrappers
# --------------------------------------------------------------------------
def _pick_hw_tile(hw, cap=2048):
    """Largest spatial tile <= cap that tiles H*W and respects lane alignment."""
    if hw <= cap or hw % 128 != 0:
        return hw
    t = (cap // 128) * 128
    while hw % t != 0:
        t -= 128
    return max(t, 128)


def _conv_bn_prelu(x_cols, w_mat, scale, shift, alpha, *, hw_tile):
    N, K, HW = x_cols.shape
    Co = w_mat.shape[0]
    return pl.pallas_call(
        _conv_bn_prelu_kernel,
        out_shape=jax.ShapeDtypeStruct((N, Co, HW), jnp.float32),
        grid_spec=pltpu.PrefetchScalarGridSpec(
            num_scalar_prefetch=0,
            grid=(N, HW // hw_tile),
            in_specs=[
                pl.BlockSpec((1, K, hw_tile), lambda n, t: (n, 0, t)),
                pl.BlockSpec((Co, K), lambda n, t: (0, 0)),   # weight resident
                pl.BlockSpec((Co, 1), lambda n, t: (0, 0)),
                pl.BlockSpec((Co, 1), lambda n, t: (0, 0)),
                pl.BlockSpec(memory_space=pltpu.MemorySpace.SMEM),
            ],
            out_specs=pl.BlockSpec((1, Co, hw_tile), lambda n, t: (n, 0, t)),
        ),
        compiler_params=pltpu.CompilerParams(
            dimension_semantics=("parallel", "parallel")),
    )(x_cols, w_mat, scale, shift, alpha)


def _conv_bn_res_prelu(x_cols, resid, w_mat, scale, shift, alpha, *, hw_tile):
    N, K, HW = x_cols.shape
    Co = w_mat.shape[0]
    return pl.pallas_call(
        _conv_bn_res_prelu_kernel,
        out_shape=jax.ShapeDtypeStruct((N, Co, HW), jnp.float32),
        grid_spec=pltpu.PrefetchScalarGridSpec(
            num_scalar_prefetch=0,
            grid=(N, HW // hw_tile),
            in_specs=[
                pl.BlockSpec((1, K, hw_tile), lambda n, t: (n, 0, t)),
                pl.BlockSpec((1, Co, hw_tile), lambda n, t: (n, 0, t)),
                pl.BlockSpec((Co, K), lambda n, t: (0, 0)),   # weight resident
                pl.BlockSpec((Co, 1), lambda n, t: (0, 0)),
                pl.BlockSpec((Co, 1), lambda n, t: (0, 0)),
                pl.BlockSpec(memory_space=pltpu.MemorySpace.SMEM),
            ],
            out_specs=pl.BlockSpec((1, Co, hw_tile), lambda n, t: (n, 0, t)),
        ),
        compiler_params=pltpu.CompilerParams(
            dimension_semantics=("parallel", "parallel")),
    )(x_cols, resid, w_mat, scale, shift, alpha)


# --------------------------------------------------------------------------
# Layout glue (XLA side): reflect pad + im2col, weight matrices, BN folding
# --------------------------------------------------------------------------
def _im2col_cf(x_nchw, dilation):
    """ReflectionPad2d(d) + 9 dilated taps -> (N, 9*C, H*W), channel-major."""
    N, C, H, W = x_nchw.shape
    d = dilation
    xp = jnp.pad(x_nchw, ((0, 0), (0, 0), (d, d), (d, d)), mode="reflect")
    taps = [
        xp[:, :, kh * d:kh * d + H, kw * d:kw * d + W].reshape(N, C, H * W)
        for kh in range(3) for kw in range(3)
    ]
    return jnp.concatenate(taps, axis=1)          # rows ordered (tap, cin)


def _weight_matrix(w_hwio):
    """(3,3,Cin,Cout) HWIO -> (Cout, 9*Cin) matching _im2col_cf row order."""
    kh, kw, cin, cout = w_hwio.shape
    return jnp.transpose(w_hwio, (3, 0, 1, 2)).reshape(cout, kh * kw * cin)


def _block_diag(mats):
    rows = sum(m.shape[0] for m in mats)
    cols = sum(m.shape[1] for m in mats)
    out = jnp.zeros((rows, cols), mats[0].dtype)
    r = c = 0
    for m in mats:
        out = out.at[r:r + m.shape[0], c:c + m.shape[1]].set(m)
        r += m.shape[0]
        c += m.shape[1]
    return out


def _fold_bn(gamma, beta, mean, var, eps=1e-5):
    scale = gamma / jnp.sqrt(var + eps)
    shift = beta - mean * scale
    return (scale.reshape(-1, 1).astype(jnp.float32),
            shift.reshape(-1, 1).astype(jnp.float32))


# --------------------------------------------------------------------------
# Module forward
# --------------------------------------------------------------------------
def inception_block_pallas(x_nchw, params, *, width, alpha_scalar, eps=1e-5,
                           hw_tile_cap=2048):
    x = x_nchw.astype(jnp.float32)
    N, C, H, W = x.shape
    HW = H * W
    hw_tile = _pick_hw_tile(HW, hw_tile_cap)
    alpha = jnp.full((1, 1), alpha_scalar, jnp.float32)

    # ---- branch stage: width dilated convs -> concat -> BN1 -> PReLU ------
    x_cols = jnp.concatenate(
        [_im2col_cf(x, 2 * i + 1) for i in range(width)], axis=1)  # (N, w*9*C, HW)
    w_all = _block_diag([_weight_matrix(params[f"w{i}"]) for i in range(width)])
    s1, sh1 = _fold_bn(params["g1"], params["b1"], params["m1"], params["v1"], eps)
    h = _conv_bn_prelu(x_cols, w_all, s1, sh1, alpha, hw_tile=hw_tile)  # (N, Cw, HW)
    Cw = h.shape[1]

    # ---- branch1x1: 3x3 conv -> BN2 -> + x -> PReLU ------------------------
    h_cols = _im2col_cf(h.reshape(N, Cw, H, W), 1)                  # (N, 9*Cw, HW)
    w_b = _weight_matrix(params["wb"])                              # (C, 9*Cw)
    s2, sh2 = _fold_bn(params["g2"], params["b2"], params["m2"], params["v2"], eps)
    out = _conv_bn_res_prelu(h_cols, x.reshape(N, C, HW), w_b, s2, sh2, alpha,
                             hw_tile=hw_tile)                       # (N, C, HW)
    return out.reshape(N, C, H, W)


# --------------------------------------------------------------------------
# Pure-JAX reference (lax convs) for in-script verification
# --------------------------------------------------------------------------
def inception_block_reference(x_nchw, params, width, alpha, eps=1e-5):
    x = jnp.transpose(x_nchw, (0, 2, 3, 1)).astype(jnp.float32)

    def conv(v, w, d):
        vp = jnp.pad(v, ((0, 0), (d, d), (d, d), (0, 0)), mode="reflect")
        return lax.conv_general_dilated(
            vp, w, window_strides=(1, 1), padding="VALID", rhs_dilation=(d, d),
            dimension_numbers=("NHWC", "HWIO", "NHWC"))

    def bn(v, g, b, m, var):
        return (v - m) / jnp.sqrt(var + eps) * g + b

    outs = [conv(x, params[f"w{i}"], 2 * i + 1) for i in range(width)]
    cat = jnp.concatenate(outs, axis=-1)
    h = bn(cat, params["g1"], params["b1"], params["m1"], params["v1"])
    h = jnp.where(h >= 0, h, alpha * h)
    o = conv(h, params["wb"], 1)
    o = bn(o, params["g2"], params["b2"], params["m2"], params["v2"])
    o = o + x
    o = jnp.where(o >= 0, o, alpha * o)
    return jnp.transpose(o, (0, 3, 1, 2))


# --------------------------------------------------------------------------
if __name__ == "__main__":
    # _InceptionBlock(input_nc=4, output_nc=4, width=2, drop_rate=0, use_bias=False)
    N, C, H, W = 2, 4, 16, 16
    WIDTH = 2
    ALPHA = 0.25          # nn.PReLU() default single parameter
    Cw = C * WIDTH

    key = jax.random.PRNGKey(0)
    keys = jax.random.split(key, 12)
    x = jax.random.normal(keys[0], (N, C, H, W), jnp.float32)

    # Deterministic synthetic parameters (conv weights in HWIO layout).
    params = {
        "w0": 0.2 * jax.random.normal(keys[1], (3, 3, C, C), jnp.float32),
        "w1": 0.2 * jax.random.normal(keys[2], (3, 3, C, C), jnp.float32),
        "wb": 0.2 * jax.random.normal(keys[3], (3, 3, Cw, C), jnp.float32),
        "g1": jax.random.uniform(keys[4], (Cw,), jnp.float32, 0.5, 1.5),
        "b1": 0.1 * jax.random.normal(keys[5], (Cw,), jnp.float32),
        "m1": 0.1 * jax.random.normal(keys[6], (Cw,), jnp.float32),
        "v1": jax.random.uniform(keys[7], (Cw,), jnp.float32, 0.5, 1.5),
        "g2": jax.random.uniform(keys[8], (C,), jnp.float32, 0.5, 1.5),
        "b2": 0.1 * jax.random.normal(keys[9], (C,), jnp.float32),
        "m2": 0.1 * jax.random.normal(keys[10], (C,), jnp.float32),
        "v2": jax.random.uniform(keys[11], (C,), jnp.float32, 0.5, 1.5),
    }

    fwd = jax.jit(functools.partial(
        inception_block_pallas, width=WIDTH, alpha_scalar=ALPHA))
    out = jax.block_until_ready(fwd(x, params))

    ref = inception_block_reference(x, params, WIDTH, ALPHA)
    assert out.shape == (N, C, H, W), out.shape
    max_err = float(jnp.max(jnp.abs(out - ref)))
    assert jnp.allclose(out, ref, atol=1e-4, rtol=1e-4), max_err

    print("KERNEL_OK")
</pallas_src>

<mosaic_0001>
module attributes {stable_mosaic.version = 11 : i64} {
  func.func @_conv_bn_prelu_kernel(%arg0: i32, %arg1: i32, %arg2: memref<1x72x256xf32, #tpu.memory_space<vmem>>, %arg3: memref<8x72xf32, #tpu.memory_space<vmem>>, %arg4: memref<8x1xf32, #tpu.memory_space<vmem>>, %arg5: memref<8x1xf32, #tpu.memory_space<vmem>>, %arg6: memref<1x1xf32, #tpu.memory_space<smem>>, %arg7: memref<1x8x256xf32, #tpu.memory_space<vmem>>) attributes {dimension_semantics = [#tpu.dimension_semantics<parallel>, #tpu.dimension_semantics<parallel>], iteration_bounds = array<i64: 2, 1>, scalar_prefetch = 0 : i64, scratch_operands = 0 : i64, tpu.core_type = #tpu.core_type<tc>, window_params = [{transform_indices = @transform_0, window_bounds = array<i64: 1, 72, 256>}, {pipeline_mode = #tpu.pipeline_mode<synchronous>, transform_indices = @transform_1, window_bounds = array<i64: 8, 72>}, {pipeline_mode = #tpu.pipeline_mode<synchronous>, transform_indices = @transform_2, window_bounds = array<i64: 8, 1>}, {pipeline_mode = #tpu.pipeline_mode<synchronous>, transform_indices = @transform_3, window_bounds = array<i64: 8, 1>}, {transform_indices = @transform_4, window_bounds = array<i64: 1, 1>}, {transform_indices = @transform_5, window_bounds = array<i64: 1, 8, 256>}]} {
    %c0 = arith.constant 0 : index
    %c0_0 = arith.constant 0 : index
    %0 = vector.load %arg3[%c0, %c0_0] : memref<8x72xf32, #tpu.memory_space<vmem>>, vector<8x72xf32>
    %c0_1 = arith.constant 0 : index
    %c0_2 = arith.constant 0 : index
    %c0_3 = arith.constant 0 : index
    %1 = vector.load %arg2[%c0_1, %c0_2, %c0_3] : memref<1x72x256xf32, #tpu.memory_space<vmem>>, vector<1x72x256xf32>
    %2 = vector.shape_cast %1 : vector<1x72x256xf32> to vector<72x256xf32>
    %cst = arith.constant dense<0.000000e+00> : vector<8x256xf32>
    %3 = tpu.matmul %0, %2, %cst {dimension_numbers = #tpu.dot_dimension_numbers<[1], [0], [0], [1], [0, 0, 1, 1], [], []>} : vector<8x72xf32>, vector<72x256xf32>, vector<8x256xf32> -> vector<8x256xf32>
    %c0_4 = arith.constant 0 : index
    %c0_5 = arith.constant 0 : index
    %4 = vector.load %arg4[%c0_4, %c0_5] : memref<8x1xf32, #tpu.memory_space<vmem>>, vector<8x1xf32>
    %5 = vector.broadcast %4 : vector<8x1xf32> to vector<8x256xf32>
    %6 = arith.mulf %3, %5 : vector<8x256xf32>
    %c0_6 = arith.constant 0 : index
    %c0_7 = arith.constant 0 : index
    %7 = vector.load %arg5[%c0_6, %c0_7] : memref<8x1xf32, #tpu.memory_space<vmem>>, vector<8x1xf32>
    %8 = vector.broadcast %7 : vector<8x1xf32> to vector<8x256xf32>
    %9 = arith.addf %6, %8 : vector<8x256xf32>
    %c0_8 = arith.constant 0 : index
    %c0_9 = arith.constant 0 : index
    %10 = memref.load %arg6[%c0_8, %c0_9] : memref<1x1xf32, #tpu.memory_space<smem>>
    %cst_10 = arith.constant 0.000000e+00 : f32
    %11 = vector.broadcast %cst_10 : f32 to vector<8x256xf32>
    %12 = arith.cmpf oge, %9, %11 : vector<8x256xf32>
    %13 = vector.broadcast %10 : f32 to vector<8x256xf32>
    %14 = arith.mulf %13, %9 : vector<8x256xf32>
    %15 = arith.select %12, %9, %14 : vector<8x256xi1>, vector<8x256xf32>
    %c0_11 = arith.constant 0 : index
    %c0_12 = arith.constant 0 : index
    %c0_13 = arith.constant 0 : index
    %16 = vector.load %arg7[%c0_11, %c0_12, %c0_13] : memref<1x8x256xf32, #tpu.memory_space<vmem>>, vector<1x8x256xf32>
    %17 = vector.shape_cast %16 : vector<1x8x256xf32> to vector<8x256xf32>
    %18 = vector.shape_cast %15 : vector<8x256xf32> to vector<1x8x256xf32>
    tpu.vector_store %arg7[%c0_11, %c0_12, %c0_13], %18 {strides = array<i32>} : memref<1x8x256xf32, #tpu.memory_space<vmem>>, vector<1x8x256xf32>,
    return
  }
  func.func @transform_0(%arg0: i32, %arg1: i32) -> (i32, i32, i32) {
    %c0_i32 = arith.constant 0 : i32
    %c0_i32_0 = arith.constant 0 : i32
    return %arg0, %c0_i32, %arg1 : i32, i32, i32
  }
  func.func @transform_1(%arg0: i32, %arg1: i32) -> (i32, i32) {
    %c0_i32 = arith.constant 0 : i32
    %c0_i32_0 = arith.constant 0 : i32
    %c0_i32_1 = arith.constant 0 : i32
    return %c0_i32, %c0_i32_0 : i32, i32
  }
  func.func @transform_2(%arg0: i32, %arg1: i32) -> (i32, i32) {
    %c0_i32 = arith.constant 0 : i32
    %c0_i32_0 = arith.constant 0 : i32
    %c0_i32_1 = arith.constant 0 : i32
    return %c0_i32, %c0_i32_0 : i32, i32
  }
  func.func @transform_3(%arg0: i32, %arg1: i32) -> (i32, i32) {
    %c0_i32 = arith.constant 0 : i32
    %c0_i32_0 = arith.constant 0 : i32
    %c0_i32_1 = arith.constant 0 : i32
    return %c0_i32, %c0_i32_0 : i32, i32
  }
  func.func @transform_4(%arg0: i32, %arg1: i32) -> (i32, i32) {
    %c0_i32 = arith.constant 0 : i32
    %c0_i32_0 = arith.constant 0 : i32
    %c0_i32_1 = arith.constant 0 : i32
    return %c0_i32, %c0_i32_0 : i32, i32
  }
  func.func @transform_5(%arg0: i32, %arg1: i32) -> (i32, i32, i32) {
    %c0_i32 = arith.constant 0 : i32
    %c0_i32_0 = arith.constant 0 : i32
    return %arg0, %c0_i32, %arg1 : i32, i32, i32
  }
}

module attributes {stable_mosaic.version = 11 : i64} {
  func.func @_conv_bn_res_prelu_kernel(%arg0: i32, %arg1: i32, %arg2: memref<1x72x256xf32, #tpu.memory_space<vmem>>, %arg3: memref<1x4x256xf32, #tpu.memory_space<vmem>>, %arg4: memref<4x72xf32, #tpu.memory_space<vmem>>, %arg5: memref<4x1xf32, #tpu.memory_space<vmem>>, %arg6: memref<4x1xf32, #tpu.memory_space<vmem>>, %arg7: memref<1x1xf32, #tpu.memory_space<smem>>, %arg8: memref<1x4x256xf32, #tpu.memory_space<vmem>>) attributes {dimension_semantics = [#tpu.dimension_semantics<parallel>, #tpu.dimension_semantics<parallel>], iteration_bounds = array<i64: 2, 1>, scalar_prefetch = 0 : i64, scratch_operands = 0 : i64, tpu.core_type = #tpu.core_type<tc>, window_params = [{transform_indices = @transform_0, window_bounds = array<i64: 1, 72, 256>}, {transform_indices = @transform_1, window_bounds = array<i64: 1, 4, 256>}, {pipeline_mode = #tpu.pipeline_mode<synchronous>, transform_indices = @transform_2, window_bounds = array<i64: 4, 72>}, {pipeline_mode = #tpu.pipeline_mode<synchronous>, transform_indices = @transform_3, window_bounds = array<i64: 4, 1>}, {pipeline_mode = #tpu.pipeline_mode<synchronous>, transform_indices = @transform_4, window_bounds = array<i64: 4, 1>}, {transform_indices = @transform_5, window_bounds = array<i64: 1, 1>}, {transform_indices = @transform_6, window_bounds = array<i64: 1, 4, 256>}]} {
    %c0 = arith.constant 0 : index
    %c0_0 = arith.constant 0 : index
    %0 = vector.load %arg4[%c0, %c0_0] : memref<4x72xf32, #tpu.memory_space<vmem>>, vector<4x72xf32>
    %c0_1 = arith.constant 0 : index
    %c0_2 = arith.constant 0 : index
    %c0_3 = arith.constant 0 : index
    %1 = vector.load %arg2[%c0_1, %c0_2, %c0_3] : memref<1x72x256xf32, #tpu.memory_space<vmem>>, vector<1x72x256xf32>
    %2 = vector.shape_cast %1 : vector<1x72x256xf32> to vector<72x256xf32>
    %cst = arith.constant dense<0.000000e+00> : vector<4x256xf32>
    %3 = tpu.matmul %0, %2, %cst {dimension_numbers = #tpu.dot_dimension_numbers<[1], [0], [0], [1], [0, 0, 1, 1], [], []>} : vector<4x72xf32>, vector<72x256xf32>, vector<4x256xf32> -> vector<4x256xf32>
    %c0_4 = arith.constant 0 : index
    %c0_5 = arith.constant 0 : index
    %4 = vector.load %arg5[%c0_4, %c0_5] : memref<4x1xf32, #tpu.memory_space<vmem>>, vector<4x1xf32>
    %5 = vector.broadcast %4 : vector<4x1xf32> to vector<4x256xf32>
    %6 = arith.mulf %3, %5 : vector<4x256xf32>
    %c0_6 = arith.constant 0 : index
    %c0_7 = arith.constant 0 : index
    %7 = vector.load %arg6[%c0_6, %c0_7] : memref<4x1xf32, #tpu.memory_space<vmem>>, vector<4x1xf32>
    %8 = vector.broadcast %7 : vector<4x1xf32> to vector<4x256xf32>
    %9 = arith.addf %6, %8 : vector<4x256xf32>
    %c0_8 = arith.constant 0 : index
    %c0_9 = arith.constant 0 : index
    %c0_10 = arith.constant 0 : index
    %10 = vector.load %arg3[%c0_8, %c0_9, %c0_10] : memref<1x4x256xf32, #tpu.memory_space<vmem>>, vector<1x4x256xf32>
    %11 = vector.shape_cast %10 : vector<1x4x256xf32> to vector<4x256xf32>
    %12 = arith.addf %9, %11 : vector<4x256xf32>
    %c0_11 = arith.constant 0 : index
    %c0_12 = arith.constant 0 : index
    %13 = memref.load %arg7[%c0_11, %c0_12] : memref<1x1xf32, #tpu.memory_space<smem>>
    %cst_13 = arith.constant 0.000000e+00 : f32
    %14 = vector.broadcast %cst_13 : f32 to vector<4x256xf32>
    %15 = arith.cmpf oge, %12, %14 : vector<4x256xf32>
    %16 = vector.broadcast %13 : f32 to vector<4x256xf32>
    %17 = arith.mulf %16, %12 : vector<4x256xf32>
    %18 = arith.select %15, %12, %17 : vector<4x256xi1>, vector<4x256xf32>
    %c0_14 = arith.constant 0 : index
    %c0_15 = arith.constant 0 : index
    %c0_16 = arith.constant 0 : index
    %19 = vector.load %arg8[%c0_14, %c0_15, %c0_16] : memref<1x4x256xf32, #tpu.memory_space<vmem>>, vector<1x4x256xf32>
    %20 = vector.shape_cast %19 : vector<1x4x256xf32> to vector<4x256xf32>
    %21 = vector.shape_cast %18 : vector<4x256xf32> to vector<1x4x256xf32>
    tpu.vector_store %arg8[%c0_14, %c0_15, %c0_16], %21 {strides = array<i32>} : memref<1x4x256xf32, #tpu.memory_space<vmem>>, vector<1x4x256xf32>,
    return
  }
  func.func @transform_0(%arg0: i32, %arg1: i32) -> (i32, i32, i32) {
    %c0_i32 = arith.constant 0 : i32
    %c0_i32_0 = arith.constant 0 : i32
    return %arg0, %c0_i32, %arg1 : i32, i32, i32
  }
  func.func @transform_1(%arg0: i32, %arg1: i32) -> (i32, i32, i32) {
    %c0_i32 = arith.constant 0 : i32
    %c0_i32_0 = arith.constant 0 : i32
    return %arg0, %c0_i32, %arg1 : i32, i32, i32
  }
  func.func @transform_2(%arg0: i32, %arg1: i32) -> (i32, i32) {
    %c0_i32 = arith.constant 0 : i32
    %c0_i32_0 = arith.constant 0 : i32
    %c0_i32_1 = arith.constant 0 : i32
    return %c0_i32, %c0_i32_0 : i32, i32
  }
  func.func @transform_3(%arg0: i32, %arg1: i32) -> (i32, i32) {
    %c0_i32 = arith.constant 0 : i32
    %c0_i32_0 = arith.constant 0 : i32
    %c0_i32_1 = arith.constant 0 : i32
    return %c0_i32, %c0_i32_0 : i32, i32
  }
  func.func @transform_4(%arg0: i32, %arg1: i32) -> (i32, i32) {
    %c0_i32 = arith.constant 0 : i32
    %c0_i32_0 = arith.constant 0 : i32
    %c0_i32_1 = arith.constant 0 : i32
    return %c0_i32, %c0_i32_0 : i32, i32
  }
  func.func @transform_5(%arg0: i32, %arg1: i32) -> (i32, i32) {
    %c0_i32 = arith.constant 0 : i32
    %c0_i32_0 = arith.constant 0 : i32
    %c0_i32_1 = arith.constant 0 : i32
    return %c0_i32, %c0_i32_0 : i32, i32
  }
  func.func @transform_6(%arg0: i32, %arg1: i32) -> (i32, i32, i32) {
    %c0_i32 = arith.constant 0 : i32
    %c0_i32_0 = arith.constant 0 : i32
    return %arg0, %c0_i32, %arg1 : i32, i32, i32
  }
}

</mosaic_0001>

<bundles_post_ra>
// kernel: inception_block_pallas.2
= control target key start
LH: loop header
LB: loop body
LE: loop exit
PB: predicated region body
PF: predicated region fallthrough
CT: control target
= control target key end

     0   :  { %s539_s20 = smov 0   ;;  %s541_s21 = smov 0   ;;  %s605_s0 = inlined_call_operand.vmem [shape: f32[2,72,256], index: 0, kind: input, shape index: {}]   ;;  %s606_s1 = inlined_call_operand.vmem [shape: f32[8,72], index: 1, kind: input, shape index: {}]   ;;  %s607_s2 = inlined_call_operand.vmem [shape: f32[8,1], index: 2, kind: input, shape index: {}]   ;;  %s608_s3 = inlined_call_operand.vmem [shape: f32[8,1], index: 3, kind: input, shape index: {}]   ;;  %s609_s4 = inlined_call_operand.<no memory space> [shape: f32[1,1], index: 4, kind: input, shape index: {}]   ;;  %s610_s5 = inlined_call_operand.vmem [shape: f32[2,8,256], index: 5, kind: output, shape index: {}]  }
   0x1   :  { %10 = sst [smem:[#allocation2]] %s609_s4  ;;  %s543_s22 = smov 0  }
   0x2 LB: > { %s28_s4 = sadd.s32 1, %s499_s21  ;;  %p445_p0 = scmp.ge.s32.totalorder %s503_s22, 1  ;;  %s503_s22 = sphi %s543_s22, %s16_s22   ;;  %s499_s21 = sphi %s541_s21, %s612_s21   ;;  %s495_s20 = sphi %s539_s20, %s611_s20  }
   0x3   : > { %p30_p1 = scmp.ge.s32.totalorder %s28_s4, 2  ;;  %p209_p2 = scmp.lt.s32.totalorder %s503_s22, 3 }
   0x5   : > { %s614_s4 = smov (%p30_p1, %s28_s4), 0  ;;  %p210_p3 = pnand %p445_p0, %p209_p2 }
   0x6   : > { %p246_p4 = scmp.lt.s32.totalorder (!%p210_p3), %s495_s20, 1  ;;  %s344_s8 = sld [smem:[#allocation2]] (!%p210_p3) }
   0x7   : > { %213 = sbr.rel (%p210_p3) target bundleno = 169 (0xa9), region = 40 }
   0xc   : > { %v328_v0 = vld [vmem:[%s607_s2] sm:$0xff]  ;;  %v505_v1 = vmov 0   ;;  %s616_s20 = smov (!%p246_p4, %s495_s20), 1  ;;  %vm284_vm0 = vcmask 588800   ;;  %v347_v28 = vstv %s344_s8 }
   0xd   : > { %480 = vset.pattern.permute.xlu0 %v505_v1  ;;  %s454_s25 = smul.u32 144, %s616_s20  ;;  %v336_v6 = vld [vmem:[%s608_s3] sm:$0xff]  ;;  %s453_s9 = sshll.u32 %s616_s20, 4 }
   0xe   : > { %331 = vperm.xlu0 %480, %v328_v0   ;;  %v265_v21 = vld [vmem:[%s606_s1] sm:$0xff]  ;;  %s263_s12 = scalar_lea.vmem %s610_s5, %s453_s9 }
   0xf   : > { %s566_s28 = scalar_lea.vmem %s605_s0, %s454_s25 }
  0x10   : > { %v282_v2 = vld [vmem:[%s566_s28 + $0x80] sm:$0xff]  ;;  %v283_v3 = vld [vmem:[%s566_s28 + $0x88] sm:$0xff]  ;;  %v280_v4 = vld [vmem:[%s566_s28 + $0x70] sm:$0xff] }
  0x11   : > { %295 = vmatpush.msra.mxu0 %v282_v2  ;;  %315 = vmatpush.msra.mxu1 %v283_v3  ;;  %v281_v5 = vld [vmem:[%s566_s28 + $0x78] sm:$0xff]  ;;  %v278_v7 = vld [vmem:[%s566_s28 + $0x60] sm:$0xff]  ;;  %v279_v8 = vld [vmem:[%s566_s28 + $0x68] sm:$0xff] }
  0x12   : > { %v276_v9 = vld [vmem:[%s566_s28 + $0x50] sm:$0xff]  ;;  %v277_v10 = vld [vmem:[%s566_s28 + $0x58] sm:$0xff]  ;;  %v274_v11 = vld [vmem:[%s566_s28 + $0x40] sm:$0xff] }
  0x13   : > { %296 = vmatpush.msra.mxu0 %v280_v4  ;;  %316 = vmatpush.msra.mxu1 %v281_v5  ;;  %v275_v12 = vld [vmem:[%s566_s28 + $0x48] sm:$0xff]  ;;  %v272_v13 = vld [vmem:[%s566_s28 + $0x30] sm:$0xff]  ;;  %v273_v14 = vld [vmem:[%s566_s28 + $0x38] sm:$0xff] }
  0x14   : > { %v270_v15 = vld [vmem:[%s566_s28 + $0x20] sm:$0xff]  ;;  %v271_v16 = vld [vmem:[%s566_s28 + $0x28] sm:$0xff]  ;;  %v268_v17 = vld [vmem:[%s566_s28 + $0x10] sm:$0xff] }
  0x15   : > { %297 = vmatpush.msra.mxu0 %v278_v7  ;;  %317 = vmatpush.msra.mxu1 %v279_v8  ;;  %v269_v18 = vld [vmem:[%s566_s28 + $0x18] sm:$0xff]  ;;  %v266_v19 = vld [vmem:[%s566_s28] sm:$0xff]  ;;  %v267_v20 = vld [vmem:[%s566_s28 + $0x8] sm:$0xff] }
  0x16   : > { %339 = vperm.xlu0 %480, %v336_v6  }
  0x17   : > { %298 = vmatpush.msra.mxu0 %v276_v9  ;;  %318 = vmatpush.msra.mxu1 %v277_v10 }
  0x19   : > { %299 = vmatpush.msra.mxu0 %v274_v11  ;;  %319 = vmatpush.msra.mxu1 %v275_v12 }
  0x1b   : > { %300 = vmatpush.msra.mxu0 %v272_v13  ;;  %320 = vmatpush.msra.mxu1 %v273_v14 }
  0x1d   : > { %301 = vmatpush.msra.mxu0 %v270_v15  ;;  %321 = vmatpush.msra.mxu1 %v271_v16 }
  0x1f   : > { %302 = vmatpush.msra.mxu0 %v268_v17  ;;  %322 = vmatpush.msra.mxu1 %v269_v18 }
  0x21   : > { %303 = vmatpush.msra.mxu0 %v266_v19  ;;  %323 = vmatpush.msra.mxu1 %v267_v20 }
  0x22   : > { %449 = vmatmul.msk.f32.vlgmr.msra.gmra.mxu0 %vm284_vm0, %v265_v21  ;;  %450 = vmatmul.msk.f32.vlgmr.msra.gmra.mxu1 %vm284_vm0, %v265_v21 }
  0x80   : > { %v332_v22 = vpop.permute.xlu0 %331 }
  0x88   : > { %v340_v27 = vpop.permute.xlu0 %339 }
  0x9f   : > { %v305_v23 = vpop.f32.mrf.mxu0  ;;  %v325_v24 = vpop.f32.mrf.mxu1 }
  0xa0   : > { %v334_v25 = vmul.f32 %v332_v22, %v305_v23  ;;  %v335_v26 = vmul.f32 %v332_v22, %v325_v24 }
  0xa2   : > { %v342_v29 = vadd.f32 %v340_v27, %v334_v25  ;;  %v343_v30 = vadd.f32 %v340_v27, %v335_v26 }
  0xa4   : > { %vm345_vm1 = vcmp.ge.f32.partialorder %v342_v29, 0.0  ;;  %v348_v31 = vmul.f32 %v347_v28, %v342_v29  ;;  %vm346_vm2 = vcmp.ge.f32.partialorder %v343_v30, 0.0  ;;  %v349_v32 = vmul.f32 %v347_v28, %v343_v30 }
  0xa6   : > { %v350_v33 = vsel %vm345_vm1, %v342_v29, %v348_v31  ;;  %v351_v34 = vsel %vm346_vm2, %v343_v30, %v349_v32 }
  0xa7   : > { %352 = vst [vmem:[%s263_s12] sm:$0xff] %v350_v33 }
  0xa8   : > { %353 = vst [vmem:[%s263_s12 + $0x8] sm:$0xff] %v351_v34 }
  0xa9 PF: > { %s16_s22 = sadd.s32 1, %s503_s22   ;;  %s611_s20 = smov %s499_s21 }
  0xaa   : > { %p13_p5 = scmp.ge.s32.totalorder %s16_s22, 4   ;;  %s612_s21 = smov %s614_s4 }
  0xac   :  { %15 = sbr.rel (!%p13_p5) target bundleno = 2 (0x2), region = 70 }

// kernel: inception_block_pallas.3
= control target key start
LH: loop header
LB: loop body
LE: loop exit
PB: predicated region body
PF: predicated region fallthrough
CT: control target
= control target key end

     0   :  { %s642_s23 = smov 0   ;;  %s644_s24 = smov 0   ;;  %s711_s0 = inlined_call_operand.vmem [shape: f32[2,72,256], index: 0, kind: input, shape index: {}]   ;;  %s712_s1 = inlined_call_operand.vmem [shape: f32[2,4,256], index: 1, kind: input, shape index: {}]   ;;  %s713_s2 = inlined_call_operand.vmem [shape: f32[4,72], index: 2, kind: input, shape index: {}]   ;;  %s714_s3 = inlined_call_operand.vmem [shape: f32[4,1], index: 3, kind: input, shape index: {}]   ;;  %s715_s4 = inlined_call_operand.vmem [shape: f32[4,1], index: 4, kind: input, shape index: {}]   ;;  %s716_s5 = inlined_call_operand.<no memory space> [shape: f32[1,1], index: 5, kind: input, shape index: {}]   ;;  %s717_s6 = inlined_call_operand.vmem [shape: f32[2,4,256], index: 6, kind: output, shape index: {}]  }
   0x1   :  { %11 = sst [smem:[#allocation2]] %s716_s5  ;;  %s646_s25 = smov 0  }
   0x2 LB: > { %s29_s5 = sadd.s32 1, %s597_s24  ;;  %p540_p0 = scmp.ge.s32.totalorder %s601_s25, 1  ;;  %s601_s25 = sphi %s646_s25, %s17_s25   ;;  %s597_s24 = sphi %s644_s24, %s719_s24   ;;  %s593_s23 = sphi %s642_s23, %s718_s23  }
   0x3   : > { %p31_p1 = scmp.ge.s32.totalorder %s29_s5, 2  ;;  %p251_p2 = scmp.lt.s32.totalorder %s601_s25, 3 }
   0x5   : > { %s721_s5 = smov (%p31_p1, %s29_s5), 0  ;;  %p252_p3 = pnand %p540_p0, %p251_p2 }
   0x6   : > { %p299_p4 = scmp.lt.s32.totalorder (!%p252_p3), %s593_s23, 1  ;;  %s416_s16 = sld [smem:[#allocation2]] (!%p252_p3) }
   0x7   : > { %255 = sbr.rel (%p252_p3) target bundleno = 173 (0xad), region = 44 }
   0xc   : > { %v391_v0 = vld [vmem:[%s714_s3] sm:$0xf]  ;;  %v603_v1 = vmov 0   ;;  %s723_s23 = smov (!%p299_p4, %s593_s23), 1  ;;  %vm347_vm0 = vcmask 588800   ;;  %v419_v33 = vstv %s416_s16  ;;  %vm427_vm3 = vcmask 1043456  }
   0xd   : > { %578 = vset.pattern.permute.xlu0 %v603_v1  ;;  %s552_s28 = smul.u32 144, %s723_s23  ;;  %v399_v6 = vld [vmem:[%s715_s4] sm:$0xf]  ;;  %s550_s12 = sshll.u32 %s723_s23, 3 }
   0xe   : > { %394 = vperm.xlu0 %578, %v391_v0   ;;  %v328_v21 = vld [vmem:[%s713_s2] sm:$0xf]  ;;  %s316_s15 = scalar_lea.vmem %s712_s1, %s550_s12  ;;  %s326_s19 = scalar_lea.vmem %s717_s6, %s550_s12 }
   0xf   : > { %s669_s7 = scalar_lea.vmem %s711_s0, %s552_s28  ;;  %v407_v22 = vld [vmem:[%s316_s15] sm:$0xff] }
  0x10   : > { %v345_v2 = vld [vmem:[%s669_s7 + $0x80] sm:$0xff]  ;;  %v346_v3 = vld [vmem:[%s669_s7 + $0x88] sm:$0xff]  ;;  %v343_v4 = vld [vmem:[%s669_s7 + $0x70] sm:$0xff]  ;;  %409 = vst [vmem:[#allocation1] ss:$2 sm:$0xff] %v407_v22 }
  0x11   : > { %358 = vmatpush.msra.mxu0 %v345_v2  ;;  %378 = vmatpush.msra.mxu1 %v346_v3  ;;  %v344_v5 = vld [vmem:[%s669_s7 + $0x78] sm:$0xff]  ;;  %v341_v7 = vld [vmem:[%s669_s7 + $0x60] sm:$0xff]  ;;  %v342_v8 = vld [vmem:[%s669_s7 + $0x68] sm:$0xff] }
  0x12   : > { %v339_v9 = vld [vmem:[%s669_s7 + $0x50] sm:$0xff]  ;;  %v340_v10 = vld [vmem:[%s669_s7 + $0x58] sm:$0xff]  ;;  %v337_v11 = vld [vmem:[%s669_s7 + $0x40] sm:$0xff] }
  0x13   : > { %359 = vmatpush.msra.mxu0 %v343_v4  ;;  %379 = vmatpush.msra.mxu1 %v344_v5  ;;  %v338_v12 = vld [vmem:[%s669_s7 + $0x48] sm:$0xff]  ;;  %v335_v13 = vld [vmem:[%s669_s7 + $0x30] sm:$0xff]  ;;  %v336_v14 = vld [vmem:[%s669_s7 + $0x38] sm:$0xff] }
  0x14   : > { %v333_v15 = vld [vmem:[%s669_s7 + $0x20] sm:$0xff]  ;;  %v334_v16 = vld [vmem:[%s669_s7 + $0x28] sm:$0xff]  ;;  %v331_v17 = vld [vmem:[%s669_s7 + $0x10] sm:$0xff] }
  0x15   : > { %360 = vmatpush.msra.mxu0 %v341_v7  ;;  %380 = vmatpush.msra.mxu1 %v342_v8  ;;  %v332_v18 = vld [vmem:[%s669_s7 + $0x18] sm:$0xff]  ;;  %v329_v19 = vld [vmem:[%s669_s7] sm:$0xff]  ;;  %v330_v20 = vld [vmem:[%s669_s7 + $0x8] sm:$0xff] }
  0x16   : > { %402 = vperm.xlu0 %578, %v399_v6  }
  0x17   : > { %361 = vmatpush.msra.mxu0 %v339_v9  ;;  %381 = vmatpush.msra.mxu1 %v340_v10  ;;  %v410_v29 = vld.sshfl [vmem:[#allocation1] sm:$0xff pattern:$0x75316420]  ;;  %v411_v30 = vld.sshfl [vmem:[#allocation1 + $0x8] sm:$0xff pattern:$0x75316420] }
  0x19   : > { %362 = vmatpush.msra.mxu0 %v337_v11  ;;  %382 = vmatpush.msra.mxu1 %v338_v12 }
  0x1b   : > { %363 = vmatpush.msra.mxu0 %v335_v13  ;;  %383 = vmatpush.msra.mxu1 %v336_v14 }
  0x1d   : > { %364 = vmatpush.msra.mxu0 %v333_v15  ;;  %384 = vmatpush.msra.mxu1 %v334_v16 }
  0x1f   : > { %365 = vmatpush.msra.mxu0 %v331_v17  ;;  %385 = vmatpush.msra.mxu1 %v332_v18 }
  0x21   : > { %366 = vmatpush.msra.mxu0 %v329_v19  ;;  %386 = vmatpush.msra.mxu1 %v330_v20 }
  0x22   : > { %546 = vmatmul.msk.f32.vlgmr.msra.gmra.mxu0 %vm347_vm0, %v328_v21  ;;  %547 = vmatmul.msk.f32.vlgmr.msra.gmra.mxu1 %vm347_vm0, %v328_v21 }
  0x80   : > { %v395_v23 = vpop.permute.xlu0 %394 }
  0x88   : > { %v403_v28 = vpop.permute.xlu0 %402 }
  0x9f   : > { %v368_v24 = vpop.f32.mrf.mxu0  ;;  %v388_v25 = vpop.f32.mrf.mxu1 }
  0xa0   : > { %v397_v26 = vmul.f32 %v395_v23, %v368_v24  ;;  %v398_v27 = vmul.f32 %v395_v23, %v388_v25 }
  0xa2   : > { %v405_v31 = vadd.f32 %v403_v28, %v397_v26  ;;  %v406_v32 = vadd.f32 %v403_v28, %v398_v27 }
  0xa4   : > { %v414_v34 = vadd.f32 %v410_v29, %v405_v31  ;;  %v415_v35 = vadd.f32 %v411_v30, %v406_v32 }
  0xa6   : > { %v420_v36 = vmul.f32 %v419_v33, %v414_v34  ;;  %vm418_vm1 = vcmp.ge.f32.partialorder %v415_v35, 0.0  ;;  %v421_v37 = vmul.f32 %v419_v33, %v415_v35  ;;  %vm417_vm2 = vcmp.ge.f32.partialorder %v414_v34, 0.0 }
  0xa8   : > { %v423_v38 = vsel %vm418_vm1, %v415_v35, %v421_v37  ;;  %v422_v40 = vsel %vm417_vm2, %v414_v34, %v420_v36 }
  0xa9   : > { %v426_v39 = vrot.slane %v423_v38, 4 }
  0xab   : > { %v428_v41 = vsel %vm427_vm3, %v422_v40, %v426_v39 }
  0xac   : > { %430 = vst [vmem:[%s326_s19] sm:$0xff] %v428_v41 }
  0xad PF: > { %s17_s25 = sadd.s32 1, %s601_s25   ;;  %s718_s23 = smov %s597_s24 }
  0xae   : > { %p14_p5 = scmp.ge.s32.totalorder %s17_s25, 4   ;;  %s719_s24 = smov %s721_s5 }
  0xb0   :  { %16 = sbr.rel (!%p14_p5) target bundleno = 2 (0x2), region = 77 }

</bundles_post_ra>
